<compile_context>
chip_gen: v7x
topology: tpu7x:2x2x1
jax: 0.10.0
libtpu: 0.0.40
codegen_flags: <defaults>
</compile_context>

<pallas_src>
import functools

import jax
import jax.numpy as jnp
from jax.experimental import pallas as pl
from jax.experimental.pallas import tpu as pltpu

# False -> exact erf GELU (matches PyTorch F.gelu default, approximate='none').
# True  -> tanh approximation (F.gelu(approximate='tanh')): much cheaper on the
# binding VALU slot but a semantic change; requires model-owner sign-off.
USE_TANH_GELU = False


def _device_kind() -> str:
    try:
        return jax.devices()[0].device_kind.lower()
    except Exception:  # pragma: no cover - backend not reachable
        return ""


_KIND = _device_kind()
_IS_V7X = "v7" in _KIND
_NUM_TENSORCORES = 2 if _IS_V7X else 1           # v5e/v6e: 1 TC per chip
_HAS_BF16_VPU = ("v6" in _KIND) or _IS_V7X        # v5e VPU has no bf16
# VMEM working-set budget for the pipeline (double-buffered x/o tiles, weights,
# activation temporaries) and the scoped-VMEM limit passed to the compiler.
#   v7x : 64 MiB physical per core -> 16 MiB working set, 32 MiB limit
#   v5e/v6e: 128 MiB physical      -> 32 MiB working set, 64 MiB limit
_VMEM_WORKING_SET_BUDGET = (16 << 20) if _IS_V7X else (32 << 20)
_VMEM_LIMIT_BYTES = (32 << 20) if _IS_V7X else (64 << 20)


def _mlp2d_kernel(x_ref, w1_ref, b1_ref, w2h_ref, b2_ref, o_ref,
                  *, gelu_dtype, tanh_approx):
    # x_ref  : (1, C_in, TS)   spatial on lanes (lane-dense loads/stores)
    # w1_ref : (C_mid, C_in)   b1_ref : (C_mid, 1)
    # w2h_ref: (C_out, C_mid)  == 0.5 * w2,   b2_ref: (C_out, 1)
    # o_ref  : (1, C_out, TS)
    x = x_ref[0]  # (C_in, TS), native dtype -> native-dtype MXU matmul

    # h = W1 @ x + b1 -> (C_mid, TS); f32 accumulate, f32 bias add.
    h = jnp.dot(w1_ref[...], x, preferred_element_type=jnp.float32)
    h = h + b1_ref[...].astype(jnp.float32)

    # GELU with the 0.5 folded into w2h:  g = h * (1 + inner(h)).
    # gelu_dtype is f32 for f32 inputs / v5e; bf16 on v6e/v7x bf16 runs.
    h = h.astype(gelu_dtype)
    if tanh_approx:
        # PyTorch F.gelu(approximate='tanh'); tanh executes on the EUP slot.
        inner = jnp.tanh(0.7978845608028654 * (h + 0.044715 * (h * h * h)))
    else:
        # Exact erf GELU (PyTorch F.gelu default).
        inner = jax.lax.erf(h * 0.7071067811865476)
    g = h * (1.0 + inner)

    # o = (0.5*W2) @ g + b2 -> (C_out, TS).  When gelu_dtype == weight dtype
    # the astype is a no-op (no separate cast pass over the activation).
    o = jnp.dot(w2h_ref[...], g.astype(w2h_ref.dtype),
                preferred_element_type=jnp.float32)
    o = o + b2_ref[...].astype(jnp.float32)

    o_ref[0] = o.astype(o_ref.dtype)


def _choose_tile_s(n_batch, spatial, bytes_per_spatial, fixed_bytes,
                   budget_bytes, num_tensorcores, max_tile=2048):
    """Pick the spatial (lane) tile.

    - multiple of 128 or the full spatial extent (8,128) rule on the BlockSpec
    - as big as the per-generation VMEM working-set budget allows (amortizes
      ~0.35us per grid step)
    - on dual-TC parts (v7x) guarantee >= 2 grid steps so both cores get work;
      never split on single-TC v5e/v6e (pure per-step overhead there).
    """
    def fits(t):
        return fixed_bytes + bytes_per_spatial * t <= budget_bytes

    tile = min(spatial, max_tile)
    if tile > 128 and not fits(tile):
        tile = max(128, (tile // 128) * 128)
        while tile > 128 and not fits(tile):
            tile -= 128

    if (num_tensorcores >= 2 and spatial >= 256
            and n_batch * pl.cdiv(spatial, tile) < 2):
        half = (tile + 1) // 2
        tile = max(128, ((half + 127) // 128) * 128)
    return tile


@jax.jit
def mlp2d_forward(x_nchw, w1, b1, w2, b2):
    """MLP2d forward: Conv2d(1x1) -> GELU -> Conv2d(1x1).

    x_nchw : (N, C_in, H, W)
    w1     : (C_mid, C_in)   (squeezed PyTorch conv1 weight)
    b1     : (C_mid,)
    w2     : (C_out, C_mid)  (squeezed PyTorch conv2 weight)
    b2     : (C_out,)
    returns: (N, C_out, H, W)
    """
    N, C_in, H, W = x_nchw.shape
    C_mid = w1.shape[0]
    C_out = w2.shape[0]
    S = H * W

    # Free view: channels on sublanes, spatial on lanes. No transpose, no pad.
    x3 = x_nchw.reshape(N, C_in, S)

    # Fold the GELU's 0.5 into w2 (exact power-of-two scale, tiny tensor).
    w2_half = w2 * 0.5
    b1_2d = b1.reshape(C_mid, 1)
    b2_2d = b2.reshape(C_out, 1)

    # GELU compute dtype: bf16 only when inputs AND weights are bf16 and the
    # chip has a bf16 VPU (v6e/v7x); otherwise exact f32 path.
    if (x_nchw.dtype == jnp.bfloat16 and w2.dtype == jnp.bfloat16
            and _HAS_BF16_VPU):
        gelu_dtype = jnp.bfloat16
    else:
        gelu_dtype = jnp.float32

    # Explicit VMEM working-set estimate (per grid step):
    #   double-buffered x/o tiles + ~4 live f32 copies of the (C_mid, tile)
    #   activation (h / erf temporaries) + double-buffered weight blocks.
    x_bytes = jnp.dtype(x_nchw.dtype).itemsize
    w_bytes = jnp.dtype(w1.dtype).itemsize
    bytes_per_spatial = 2 * (C_in + C_out) * x_bytes + 4 * C_mid * 4
    fixed_bytes = 2 * w_bytes * (C_mid * C_in + C_mid + C_out * C_mid + C_out)
    tile_s = _choose_tile_s(N, S, bytes_per_spatial, fixed_bytes,
                            _VMEM_WORKING_SET_BUDGET, _NUM_TENSORCORES)
    grid = (N, pl.cdiv(S, tile_s))

    kernel = functools.partial(_mlp2d_kernel, gelu_dtype=gelu_dtype,
                               tanh_approx=USE_TANH_GELU)

    out3 = pl.pallas_call(
        kernel,
        out_shape=jax.ShapeDtypeStruct((N, C_out, S), x_nchw.dtype),
        grid_spec=pltpu.PrefetchScalarGridSpec(
            num_scalar_prefetch=0,
            grid=grid,
            in_specs=[
                pl.BlockSpec((1, C_in, tile_s), lambda n, s: (n, 0, s)),
                # Constant blocks (index_map is constant -> never re-DMA'd).
                # Double-buffered footprint here is <1 KiB; for production
                # channel widths set pipeline_mode=pl.Buffered(1) to halve it.
                pl.BlockSpec((C_mid, C_in), lambda n, s: (0, 0)),
                pl.BlockSpec((C_mid, 1), lambda n, s: (0, 0)),
                pl.BlockSpec((C_out, C_mid), lambda n, s: (0, 0)),
                pl.BlockSpec((C_out, 1), lambda n, s: (0, 0)),
            ],
            out_specs=pl.BlockSpec((1, C_out, tile_s), lambda n, s: (n, 0, s)),
        ),
        compiler_params=pltpu.CompilerParams(
            # Batch and spatial steps are independent -> shard across cores.
            dimension_semantics=("parallel", "parallel"),
            vmem_limit_bytes=_VMEM_LIMIT_BYTES,
        ),
    )(x3, w1, b1_2d, w2_half, b2_2d)

    # Free reshape back to NCHW (no transpose needed).
    return out3.reshape(N, C_out, H, W)


def init_params(key, in_channels, mid_channels, out_channels, dtype=jnp.float32):
    """Deterministic synthetic params with squeezed nn.Conv2d(k=1) shapes."""
    k1, k2, k3, k4 = jax.random.split(key, 4)
    w1 = (jax.random.normal(k1, (mid_channels, in_channels), dtype)
          * (1.0 / jnp.sqrt(in_channels)))
    b1 = jax.random.normal(k2, (mid_channels,), dtype) * 0.01
    w2 = (jax.random.normal(k3, (out_channels, mid_channels), dtype)
          * (1.0 / jnp.sqrt(mid_channels)))
    b2 = jax.random.normal(k4, (out_channels,), dtype) * 0.01
    return w1, b1, w2, b2


def mlp2d_reference(x_nchw, w1, b1, w2, b2):
    """Pure-JAX reference (same math as PyTorch MLP2d with 1x1 convs)."""
    h = jnp.einsum("oi,nihw->nohw", w1, x_nchw) + b1[None, :, None, None]
    h = 0.5 * h * (1.0 + jax.lax.erf(h / jnp.sqrt(2.0)))
    o = jnp.einsum("oi,nihw->nohw", w2, h) + b2[None, :, None, None]
    return o


if __name__ == "__main__":
    key = jax.random.PRNGKey(0)
    kx, kp = jax.random.split(key)

    # Shapes consistent with MLP2d(in_channels=4, out_channels=4, mid_channels=32)
    N, C_in, H, W = 2, 4, 16, 16
    C_mid, C_out = 32, 4

    x = jax.random.normal(kx, (N, C_in, H, W), jnp.float32)
    w1, b1, w2, b2 = init_params(kp, C_in, C_mid, C_out)

    out = jax.block_until_ready(mlp2d_forward(x, w1, b1, w2, b2))

    ref = mlp2d_reference(x, w1, b1, w2, b2)
    assert out.shape == (N, C_out, H, W), out.shape
    assert jnp.allclose(out, ref, atol=1e-4, rtol=1e-4), "mismatch vs reference"

    print("KERNEL_OK")
</pallas_src>

<mosaic_0001>
module attributes {stable_mosaic.version = 11 : i64} {
  func.func @_mlp2d_kernel(%arg0: i32, %arg1: i32, %arg2: memref<1x4x256xf32, #tpu.memory_space<vmem>>, %arg3: memref<32x4xf32, #tpu.memory_space<vmem>>, %arg4: memref<32x1xf32, #tpu.memory_space<vmem>>, %arg5: memref<4x32xf32, #tpu.memory_space<vmem>>, %arg6: memref<4x1xf32, #tpu.memory_space<vmem>>, %arg7: memref<1x4x256xf32, #tpu.memory_space<vmem>>) attributes {dimension_semantics = [#tpu.dimension_semantics<parallel>, #tpu.dimension_semantics<parallel>], iteration_bounds = array<i64: 2, 1>, scalar_prefetch = 0 : i64, scratch_operands = 0 : i64, tpu.core_type = #tpu.core_type<tc>, window_params = [{transform_indices = @transform_0, window_bounds = array<i64: 1, 4, 256>}, {pipeline_mode = #tpu.pipeline_mode<synchronous>, transform_indices = @transform_1, window_bounds = array<i64: 32, 4>}, {pipeline_mode = #tpu.pipeline_mode<synchronous>, transform_indices = @transform_2, window_bounds = array<i64: 32, 1>}, {pipeline_mode = #tpu.pipeline_mode<synchronous>, transform_indices = @transform_3, window_bounds = array<i64: 4, 32>}, {pipeline_mode = #tpu.pipeline_mode<synchronous>, transform_indices = @transform_4, window_bounds = array<i64: 4, 1>}, {transform_indices = @transform_5, window_bounds = array<i64: 1, 4, 256>}]} {
    %c0 = arith.constant 0 : index
    %c0_0 = arith.constant 0 : index
    %c0_1 = arith.constant 0 : index
    %0 = vector.load %arg2[%c0, %c0_0, %c0_1] : memref<1x4x256xf32, #tpu.memory_space<vmem>>, vector<1x4x256xf32>
    %1 = vector.shape_cast %0 : vector<1x4x256xf32> to vector<4x256xf32>
    %c0_2 = arith.constant 0 : index
    %c0_3 = arith.constant 0 : index
    %2 = vector.load %arg3[%c0_2, %c0_3] : memref<32x4xf32, #tpu.memory_space<vmem>>, vector<32x4xf32>
    %cst = arith.constant dense<0.000000e+00> : vector<32x256xf32>
    %3 = tpu.matmul %2, %1, %cst {dimension_numbers = #tpu.dot_dimension_numbers<[1], [0], [0], [1], [0, 0, 1, 1], [], []>} : vector<32x4xf32>, vector<4x256xf32>, vector<32x256xf32> -> vector<32x256xf32>
    %c0_4 = arith.constant 0 : index
    %c0_5 = arith.constant 0 : index
    %4 = vector.load %arg4[%c0_4, %c0_5] : memref<32x1xf32, #tpu.memory_space<vmem>>, vector<32x1xf32>
    %5 = vector.broadcast %4 : vector<32x1xf32> to vector<32x256xf32>
    %6 = arith.addf %3, %5 : vector<32x256xf32>
    %cst_6 = arith.constant 0.707106769 : f32
    %7 = vector.broadcast %cst_6 : f32 to vector<32x256xf32>
    %8 = arith.mulf %6, %7 : vector<32x256xf32>
    %9 = math.erf %8 : vector<32x256xf32>
    %cst_7 = arith.constant 1.000000e+00 : f32
    %10 = vector.broadcast %cst_7 : f32 to vector<32x256xf32>
    %11 = arith.addf %10, %9 : vector<32x256xf32>
    %12 = arith.mulf %6, %11 : vector<32x256xf32>
    %c0_8 = arith.constant 0 : index
    %c0_9 = arith.constant 0 : index
    %13 = vector.load %arg5[%c0_8, %c0_9] : memref<4x32xf32, #tpu.memory_space<vmem>>, vector<4x32xf32>
    %cst_10 = arith.constant dense<0.000000e+00> : vector<4x256xf32>
    %14 = tpu.matmul %13, %12, %cst_10 {dimension_numbers = #tpu.dot_dimension_numbers<[1], [0], [0], [1], [0, 0, 1, 1], [], []>} : vector<4x32xf32>, vector<32x256xf32>, vector<4x256xf32> -> vector<4x256xf32>
    %c0_11 = arith.constant 0 : index
    %c0_12 = arith.constant 0 : index
    %15 = vector.load %arg6[%c0_11, %c0_12] : memref<4x1xf32, #tpu.memory_space<vmem>>, vector<4x1xf32>
    %16 = vector.broadcast %15 : vector<4x1xf32> to vector<4x256xf32>
    %17 = arith.addf %14, %16 : vector<4x256xf32>
    %c0_13 = arith.constant 0 : index
    %c0_14 = arith.constant 0 : index
    %c0_15 = arith.constant 0 : index
    %18 = vector.load %arg7[%c0_13, %c0_14, %c0_15] : memref<1x4x256xf32, #tpu.memory_space<vmem>>, vector<1x4x256xf32>
    %19 = vector.shape_cast %18 : vector<1x4x256xf32> to vector<4x256xf32>
    %20 = vector.shape_cast %17 : vector<4x256xf32> to vector<1x4x256xf32>
    tpu.vector_store %arg7[%c0_13, %c0_14, %c0_15], %20 {strides = array<i32>} : memref<1x4x256xf32, #tpu.memory_space<vmem>>, vector<1x4x256xf32>,
    return
  }
  func.func @transform_0(%arg0: i32, %arg1: i32) -> (i32, i32, i32) {
    %c0_i32 = arith.constant 0 : i32
    %c0_i32_0 = arith.constant 0 : i32
    return %arg0, %c0_i32, %arg1 : i32, i32, i32
  }
  func.func @transform_1(%arg0: i32, %arg1: i32) -> (i32, i32) {
    %c0_i32 = arith.constant 0 : i32
    %c0_i32_0 = arith.constant 0 : i32
    %c0_i32_1 = arith.constant 0 : i32
    return %c0_i32, %c0_i32_0 : i32, i32
  }
  func.func @transform_2(%arg0: i32, %arg1: i32) -> (i32, i32) {
    %c0_i32 = arith.constant 0 : i32
    %c0_i32_0 = arith.constant 0 : i32
    %c0_i32_1 = arith.constant 0 : i32
    return %c0_i32, %c0_i32_0 : i32, i32
  }
  func.func @transform_3(%arg0: i32, %arg1: i32) -> (i32, i32) {
    %c0_i32 = arith.constant 0 : i32
    %c0_i32_0 = arith.constant 0 : i32
    %c0_i32_1 = arith.constant 0 : i32
    return %c0_i32, %c0_i32_0 : i32, i32
  }
  func.func @transform_4(%arg0: i32, %arg1: i32) -> (i32, i32) {
    %c0_i32 = arith.constant 0 : i32
    %c0_i32_0 = arith.constant 0 : i32
    %c0_i32_1 = arith.constant 0 : i32
    return %c0_i32, %c0_i32_0 : i32, i32
  }
  func.func @transform_5(%arg0: i32, %arg1: i32) -> (i32, i32, i32) {
    %c0_i32 = arith.constant 0 : i32
    %c0_i32_0 = arith.constant 0 : i32
    return %arg0, %c0_i32, %arg1 : i32, i32, i32
  }
}

</mosaic_0001>

<bundles_post_ra>
// kernel: mlp2d_forward.1
= control target key start
LH: loop header
LB: loop body
LE: loop exit
PB: predicated region body
PF: predicated region fallthrough
CT: control target
= control target key end

     0   :  { %10 = vsyncpa [#allocation3], 0  ;;  %s1460_s0 = inlined_call_operand.hbm [shape: f32[2,4,256], index: 0, kind: input, shape index: {}]   ;;  %s1461_s1 = inlined_call_operand.hbm [shape: f32[32,4], index: 1, kind: input, shape index: {}]   ;;  %s1462_s2 = inlined_call_operand.hbm [shape: f32[32,1], index: 2, kind: input, shape index: {}]   ;;  %s1463_s3 = inlined_call_operand.hbm [shape: f32[4,32], index: 3, kind: input, shape index: {}]   ;;  %s1464_s4 = inlined_call_operand.hbm [shape: f32[4,1], index: 4, kind: input, shape index: {}]   ;;  %s1465_s5 = inlined_call_operand.hbm [shape: f32[2,4,256], index: 5, kind: output, shape index: {}]  }
   0x1   :  { %12 = vsyncpa [#allocation3 + $0x1], 0 }
   0x2   :  { %13 = vsyncpa [#allocation6], 0 }
   0x3   :  { %14 = vsyncpa [#allocation9], 0 }
   0x4   :  { %15 = vsyncpa [#allocation4], 0 }
   0x5   :  { %17 = vsyncpa [#allocation4 + $0x1], 0  ;;  %s1151_s18 = smov 0   ;;  %s1153_s19 = smov 0  }
   0x6   :  { %s1155_s20 = smov 0   ;;  %s1157_s21 = smov 0  }
   0x7   :  { %s1159_s22 = smov 0   ;;  %s1161_s23 = smov 0  }
   0x8 LB: > { %s711_s24 = sadd.s32 4294967295, %s1109_s23   ;;  %p713_p0 = scmp.ge.s32.totalorder %s1109_s23, 1  ;;  %s1109_s23 = sphi %s1161_s23, %s23_s23   ;;  %s1105_s22 = sphi %s1159_s22, %s1489_s22   ;;  %s1101_s21 = sphi %s1157_s21, %s1488_s21   ;;  %s1097_s20 = sphi %s1155_s20, %s1487_s20   ;;  %s1093_s19 = sphi %s1153_s19, %s1486_s19   ;;  %s1089_s18 = sphi %s1151_s18, %s1485_s18  }
   0x9   : > { %p1185_p1 = scmp.eq.s32.totalorder %s711_s24, 0  ;;  %p180_p2 = scmp.lt.s32.totalorder %s1109_s23, 3 }
   0xa   : > { %s1111_s27 = smov [#allocation5]   ;;  %s1112_s30 = smov [#allocation8]  }
   0xb   : > { %s1470_s25 = scalar_select %p1185_p1, 1, 0 }
   0xc   : > { %p1190_p3 = pnand %p713_p0, %p180_p2  ;;  %s192_s28 = sshll.u32 %s1111_s27, 4  ;;  %s1194_s28 = int_to_ptr.vmem [resolvable:$true] %s192_s28 }
   0xd   : > { %s219_s6 = sshll.u32 %s1112_s30, 4  ;;  %s1113_s7 = smov [#allocation7]   ;;  %s1205_s6 = int_to_ptr.vmem [resolvable:$true] %s219_s6 }
   0xe   : > { %s1471_s26 = scalar_select %p1190_p3, 1, 0 }
   0xf   : > { %p771_p4 = pneg %p1190_p3  ;;  %s1207_s8 = sshll.u32 %s1113_s7, 4  ;;  %s206_s8 = int_to_ptr.vmem [resolvable:$true] %s1207_s8 }
  0x10   : > { %s877_s11 = scalar_lea.hbm %s1461_s1, 512 }
  0x11   : > { %p1201_p6 = pnand %p771_p4, %p1185_p1  ;;  %p878_p7 = scmp.ne.s32.totalorder %s1461_s1, %s877_s11 }
  0x12   : > { %p884_p11 = scmp.lt.u32.totalorder %s877_s11, %s1461_s1 }
  0x13   : > { %p1217_p8 = pneg %p1201_p6 }
  0x15   : > { %p880_p9 = pnand %p1217_p8, %p878_p7 }
  0x17   : > { %p881_p10 = pneg %p880_p9 }
  0x19   : > { %p886_p12 = pnand %p884_p11, %p881_p10 }
  0x1b   : > { %889 = shalt.err (!%p886_p12)
}
  0x1c   : > { %s890_s17 = scalar_lea.vmem %s1194_s28, 512  ;;  %p898_p4 = scmp.lt.s32.totalorder %s1194_s28, %s1194_s28 }
  0x1d   : > { %p891_p13 = scmp.ne.s32.totalorder %s1194_s28, %s890_s17  ;;  %p899_p5 = scmp.lt.s32.totalorder %s890_s17, %s890_s17 }
  0x1f   : > { %p893_p0 = pnand %p891_p13, %p1217_p8  ;;  %p900_p7 = por %p899_p5, %p898_p4 }
  0x21   : > { %p894_p2 = pneg %p893_p0 }
  0x23   : > { %p901_p9 = pnand %p900_p7, %p894_p2 }
  0x25   : > { %904 = shalt.err (!%p901_p9)
}
  0x26   : > { %s1114_s27 = smov 128   ;;  %s1115_s30 = smov 8  }
  0x27   : > { %774 = dma.hbm_to_vmem [thread:$0]  (!%p1201_p6), %s1461_s1, 512, %s1194_s28, [#allocation6], %s1114_s27, %s1114_s27, %s1115_s30  }
  0x28   : > { %s905_s12 = scalar_lea.hbm %s1463_s3, 64 }
  0x29   : > { %p906_p5 = scmp.ne.s32.totalorder %s1463_s3, %s905_s12  ;;  %p912_p12 = scmp.lt.u32.totalorder %s905_s12, %s1463_s3 }
  0x2b   : > { %p908_p10 = pnand %p906_p5, %p1217_p8 }
  0x2d   : > { %p909_p11 = pneg %p908_p10 }
  0x2f   : > { %p914_p13 = pnand %p912_p12, %p909_p11 }
  0x31   : > { %917 = shalt.err (!%p914_p13)
}
  0x32   : > { %s918_s28 = scalar_lea.vmem %s1205_s6, 64  ;;  %p926_p7 = scmp.lt.s32.totalorder %s1205_s6, %s1205_s6 }
  0x33   : > { %p919_p0 = scmp.ne.s32.totalorder %s1205_s6, %s918_s28  ;;  %p927_p9 = scmp.lt.s32.totalorder %s918_s28, %s918_s28 }
  0x35   : > { %p921_p2 = pnand %p919_p0, %p1217_p8  ;;  %p928_p5 = por %p927_p9, %p926_p7 }
  0x37   : > { %p922_p4 = pneg %p921_p2 }
  0x39   : > { %p929_p10 = pnand %p928_p5, %p922_p4 }
  0x3b   : > { %932 = shalt.err (!%p929_p10)
}
  0x3c   : > { %780 = dma.hbm_to_vmem [thread:$0]  (!%p1201_p6), %s1463_s3, 64, %s1205_s6, [#allocation9]  }
  0x3d   : > { %s933_s12 = scalar_lea.hbm %s1462_s2, 512 }
  0x3e   : > { %p934_p11 = scmp.ne.s32.totalorder %s1462_s2, %s933_s12  ;;  %p940_p0 = scmp.lt.u32.totalorder %s933_s12, %s1462_s2 }
  0x40   : > { %p936_p12 = pnand %p934_p11, %p1217_p8 }
  0x42   : > { %p937_p13 = pneg %p936_p12 }
  0x44   : > { %p942_p2 = pnand %p940_p0, %p937_p13 }
  0x46   : > { %945 = shalt.err (!%p942_p2)
}
  0x47   : > { %s946_s28 = scalar_lea.vmem %s206_s8, 512  ;;  %p954_p5 = scmp.lt.s32.totalorder %s206_s8, %s206_s8 }
  0x48   : > { %p947_p4 = scmp.ne.s32.totalorder %s206_s8, %s946_s28  ;;  %p955_p10 = scmp.lt.s32.totalorder %s946_s28, %s946_s28 }
  0x4a   : > { %p949_p7 = pnand %p947_p4, %p1217_p8  ;;  %p956_p3 = por %p955_p10, %p954_p5 }
  0x4c   : > { %p950_p9 = pneg %p949_p7 }
  0x4e   : > { %p957_p1 = pnand %p956_p3, %p950_p9 }
  0x50   : > { %960 = shalt.err (!%p957_p1)
}
  0x51   : > { %777 = dma.hbm_to_vmem [thread:$0]  (!%p1201_p6), %s1462_s2, 512, %s206_s8, [#allocation6], %s1114_s27, %s1114_s27, %s1115_s30  }
  0x52   : > { %s1116_s9 = smov [#allocation10]   ;;  %s961_s13 = scalar_lea.hbm %s1464_s4, 64 }
  0x53   : > { %s230_s10 = sshll.u32 %s1116_s9, 4  ;;  %p962_p1 = scmp.ne.s32.totalorder %s1464_s4, %s961_s13  ;;  %s231_s10 = int_to_ptr.vmem [resolvable:$true] %s230_s10 }
  0x54   : > { %p968_p12 = scmp.lt.u32.totalorder %s961_s13, %s1464_s4 }
  0x55   : > { %p964_p3 = pnand %p962_p1, %p1217_p8 }
  0x57   : > { %p965_p11 = pneg %p964_p3 }
  0x59   : > { %p970_p13 = pnand %p968_p12, %p965_p11 }
  0x5b   : > { %973 = shalt.err (!%p970_p13)
}
  0x5c   : > { %s974_s8 = scalar_lea.vmem %s231_s10, 64  ;;  %p982_p7 = scmp.lt.s32.totalorder %s231_s10, %s231_s10 }
  0x5d   : > { %p975_p0 = scmp.ne.s32.totalorder %s231_s10, %s974_s8  ;;  %p983_p9 = scmp.lt.s32.totalorder %s974_s8, %s974_s8 }
  0x5f   : > { %p977_p2 = pnand %p975_p0, %p1217_p8  ;;  %p984_p5 = por %p983_p9, %p982_p7 }
  0x61   : > { %p978_p4 = pneg %p977_p2 }
  0x63   : > { %p985_p10 = pnand %p984_p5, %p978_p4 }
  0x65   : > { %988 = shalt.err (!%p985_p10)
}
  0x66   : > { %783 = dma.hbm_to_vmem [thread:$0]  (!%p1201_p6), %s1464_s4, 64, %s231_s10, [#allocation9]  }
  0x67   : > { %s712_s14 = sadd.s32 4294967294, %s1109_s23   ;;  %s35_s6 = sadd.s32 1, %s1105_s22 }
  0x68   : > { %p37_p8 = scmp.ge.s32.totalorder %s35_s6, 2  ;;  %s44_s29 = sadd.s32 1, %s1097_s20 }
  0x69   : > { %p51_p1 = scmp.ne.s32.totalorder %s1097_s20, %s1093_s19  ;;  %p52_p3 = scmp.eq.s32.totalorder %s1109_s23, 0 }
  0x6a   : > { %s1491_s6 = smov (%p37_p8, %s35_s6), 0  ;;  %p57_p12 = scmp.ne.s32.totalorder %s1093_s19, %s1089_s18 }
  0x6b   : > { %p1312_p11 = por %p52_p3, %p51_p1  ;;  %s39_s9 = ssub.s32 %s1105_s22, %s1491_s6 }
  0x6c   : > { %p167_p6 = scmp.eq.s32.totalorder %s711_s24, 1  ;;  %p42_p13 = scmp.eq.s32.totalorder %s39_s9, 0 }
  0x6d   : > { %p1475_p0 = scmp.ne.s32.totalorder %s1470_s25, 0  ;;  %p173_p7 = scmp.eq.s32.totalorder %s712_s14, 1 }
  0x6e   : > { %p1328_p4 = por %p167_p6, %p51_p1  ;;  %p796_p5 = scmp.lt.s32.totalorder %s1109_s23, 2 }
  0x6f   : > { %p1324_p2 = por %p1475_p0, %p57_p12  ;;  %p1335_p9 = por %p173_p7, %p57_p12 }
  0x70   : > { %s1477_s11 = scalar_select %p1328_p4, 1, 0 }
  0x71   : > { %s1333_s12 = scalar_select %p42_p13, %s1097_s20, %s44_s29  }
  0x72   : > { %s1478_s13 = scalar_select %p1335_p9, 1, 0 }
  0x73   : > { %s241_s15 = sand.u32 1, %s1097_s20   ;;  %s741_s24 = sshll.u32 %s1105_s22, 7 }
  0x74   : > { %s719_s16 = sshll.u32 %s241_s15, 3  ;;  %s1345_s8 = scalar_lea.hbm %s1460_s0, %s741_s24 }
  0x75   : > { %s245_s27 = scalar_lea.vmem [#allocation2], %s719_s16  ;;  %p1349_p10 = pnand %p796_p5, %p1312_p11 }
  0x76   : > { %s255_s30 = sshll.u32 %s245_s27, 4  ;;  %s242_s29 = scalar_lea.sflag [#allocation3], %s241_s15  ;;  %s1353_s30 = int_to_ptr.vmem [resolvable:$true] %s255_s30 }
  0x77   : > { %s989_s9 = scalar_lea.hbm %s1345_s8, 128  ;;  %p991_p1 = pneg %p1349_p10 }
  0x78   : > { %p990_p8 = scmp.ne.s32.totalorder %s1345_s8, %s989_s9  ;;  %s994_s7 = scalar_lea.hbm %s1460_s0, 256 }
  0x79   : > { %p995_p11 = scmp.lt.u32.totalorder %s1345_s8, %s1460_s0  ;;  %p996_p6 = scmp.lt.u32.totalorder %s994_s7, %s989_s9 }
  0x7a   : > { %p992_p3 = pnand %p991_p1, %p990_p8  ;;  %p998_p0 = scmp.lt.u32.totalorder %s989_s9, %s1345_s8 }
  0x7b   : > { %p997_p13 = por %p996_p6, %p995_p11 }
  0x7c   : > { %p993_p12 = pneg %p992_p3 }
  0x7d   : > { %p999_p7 = por %p998_p0, %p997_p13 }
  0x7f   : > { %p1000_p5 = pnand %p999_p7, %p993_p12 }
  0x81   : > { %1003 = shalt.err (!%p1000_p5)
}
  0x82   : > { %s1004_s15 = scalar_lea.vmem %s1353_s30, 128  ;;  %s1117_s27 = smov [#allocation2]  }
  0x83   : > { %p1005_p8 = scmp.ne.s32.totalorder %s1353_s30, %s1004_s15  ;;  %s1009_s24 = sshll.u32 %s1117_s27, 4  ;;  %s1010_s24 = int_to_ptr.vmem [resolvable:$false] %s1009_s24 }
  0x84   : > { %s1011_s16 = scalar_lea.vmem %s1010_s24, 256  ;;  %p1012_p4 = scmp.lt.s32.totalorder %s1353_s30, %s1010_s24 }
  0x85   : > { %p1007_p3 = pnand %p1005_p8, %p991_p1  ;;  %p1013_p11 = scmp.lt.s32.totalorder %s1011_s16, %s1004_s15 }
  0x87   : > { %p1008_p9 = pneg %p1007_p3  ;;  %p1014_p6 = por %p1013_p11, %p1012_p4 }
  0x89   : > { %p1015_p13 = pnand %p1014_p6, %p1008_p9 }
  0x8b   : > { %1018 = shalt.err (!%p1015_p13)
}
  0x8c   : > { %787 = dma.hbm_to_vmem [thread:$0]  (!%p1349_p10), %s1345_s8, 128, %s1353_s30, %s242_s29  }
  0x8d   : > { %p1480_p12 = scmp.ne.s32.totalorder %s1471_s26, 0 }
  0x8e   : > { %s1383_s9 = sand.u32 (!%p1480_p12), 1, %s1093_s19  }
  0x8f   : > { %264 = sbr.rel (%p1480_p12) target bundleno = 642 (0x282), region = 40  ;;  %s723_s7 = sshll.u32 (!%p1480_p12), %s1383_s9, 3 }
  0x90   : > { %s267_s17 = scalar_lea.sflag (!%p1480_p12), [#allocation3], %s1383_s9  ;;  %s270_s28 = scalar_lea.vmem (!%p1480_p12), [#allocation2], %s723_s7 }
  0x96   : > { %1072 = dma.done.wait (%p1324_p2), %s267_s17, 128  }
  0x97   : > { %1074 = vsyncadd (%p1324_p2), %s267_s17, 4294967168  ;;  %p1481_p4 = scmp.ne.s32.totalorder %s1470_s25, 0 }
  0x99   : > { %1076 = dma.done.wait (%p1481_p4), [#allocation6], 1024  }
  0x9a   : > { %1078 = vsyncadd (%p1481_p4), [#allocation6], 4294966272 }
  0x9b   : > { %1080 = dma.done.wait (%p1481_p4), [#allocation9], 128  }
  0x9c   : > { %1082 = vsyncadd (%p1481_p4), [#allocation9], 4294967168  ;;  %v1118_v0 = vmov 0.0   ;;  %v1119_v1 = vmov 0   ;;  %v315_v2 = vld [vmem:[%s270_s28] sm:$0xff]  ;;  %vm359_vm0 = vcmask 1043456  }
  0x9d   : > { %428 = vmatprep.mubr.f32.mxu0 %v1118_v0  ;;  %858 = vset.pattern.permute.xlu0 %v1119_v1  ;;  %v345_v3 = vcombine.high %v315_v2, %v315_v2  ;;  %v320_v4 = vld [vmem:[#allocation7] sm:$0xff]  ;;  %vm346_vm1 = vcmask 31744   ;;  %v322_v6 = vld [vmem:[#allocation7 + $0x10] sm:$0xff]  ;;  %v321_v7 = vld [vmem:[#allocation7 + $0x8] sm:$0xff]  ;;  %vm492_vm2 = vcmask 261120   ;;  %s742_s25 = sshll.u32 %s1101_s21, 7 }
  0x9e   : > { %859 = vset.pattern.permute.xlu1 %v1119_v1  ;;  %560 = vmatprep.mubr.f32.mxu1 %v1118_v0  ;;  %v316_v5 = vld [vmem:[#allocation5] sm:$0xff]  ;;  %v323_v8 = vld [vmem:[#allocation7 + $0x18] sm:$0xff]  ;;  %v317_v9 = vld [vmem:[#allocation5 + $0x8] sm:$0xff]  ;;  %s312_s26 = scalar_lea.vmem [#allocation11], %s723_s7  ;;  %s1411_s14 = scalar_lea.hbm %s1465_s5, %s742_s25 }
  0x9f   : > { %326 = vperm.xlu0 %858, %v320_v4   ;;  %729 = vmatprep.subr.msk.mxu0 %vm359_vm0, %v345_v3  ;;  %v486_v10 = vld [vmem:[#allocation10] sm:$0xf]  ;;  %v318_v11 = vld [vmem:[#allocation5 + $0x10] sm:$0xff]  ;;  %v319_v12 = vld [vmem:[#allocation5 + $0x18] sm:$0xff]  ;;  %s589_s10 = sshll.u32 %s312_s26, 4  ;;  %s573_s29 = scalar_lea.sflag [#allocation4], %s1383_s9  ;;  %s1413_s10 = int_to_ptr.vmem [resolvable:$true] %s589_s10 }
  0xa0   : > { %336 = vperm.xlu1 %859, %v322_v6   ;;  %730 = vmatpush1.msk.msra.mxu0 %vm359_vm0, %v315_v2  ;;  %s1019_s15 = scalar_lea.vmem %s1413_s10, 128  ;;  %p1482_p9 = scmp.ne.s32.totalorder %s1477_s11, 0 }
  0xa1   : > { %731 = vmatmul.mubr.msk.f32.vlgmr.msra.gmra.mrb[0].mxu0 %vm346_vm1, %v316_v5  ;;  %v485_v5 = vld [vmem:[#allocation8] sm:$0xf]  ;;  %p1020_p2 = scmp.ne.s32.totalorder %s1413_s10, %s1019_s15  ;;  %s1120_s21 = smov [#allocation11]  }
  0xa2   : > { %434 = vmatprep.mubr.f32.mxu0 %v1118_v0  ;;  %s1023_s27 = sshll.u32 %s1120_s21, 4  ;;  %s1024_s27 = int_to_ptr.vmem [resolvable:$false] %s1023_s27 }
  0xa3   : > { %331 = vperm.xlu0 %858, %v321_v7   ;;  %p1021_p10 = pnand %p1020_p2, %p1482_p9  ;;  %s1025_s24 = scalar_lea.vmem %s1024_s27, 256 }
  0xa4   : > { %341 = vperm.xlu1 %859, %v323_v8   ;;  %p1026_p0 = scmp.lt.s32.totalorder %s1413_s10, %s1024_s27  ;;  %p1027_p7 = scmp.lt.s32.totalorder %s1025_s24, %s1019_s15 }
  0xa5   : > { %732 = vmatmul.mubr.msk.f32.gmra.mrb[2].mxu0 %vm346_vm1, %v317_v9  ;;  %p1022_p1 = pneg %p1021_p10 }
  0xa6   : > { %440 = vmatprep.mubr.f32.mxu0 %v1118_v0  ;;  %p1028_p5 = por %p1027_p7, %p1026_p0 }
  0xa7   : > { %489 = vperm.xlu0 %858, %v486_v10  }
  0xa8   : > { %p1029_p8 = pnand %p1028_p5, %p1022_p1 }
  0xa9   : > { %733 = vmatmul.mubr.msk.f32.gmra.mrb[4].mxu0 %vm346_vm1, %v318_v11 }
  0xaa   : > { %446 = vmatprep.mubr.f32.mxu0 %v1118_v0 }
  0xad   : > { %734 = vmatmul.mubr.msk.f32.gmra.mrb[6].mxu0 %vm346_vm1, %v319_v12 }
 0x11e   : > { %v327_v13 = vpop.permute.xlu0 %326 }
 0x11f   : > { %v337_v24 = vpop.permute.xlu1 %336 }
 0x122   : > { %v332_v19 = vpop.permute.xlu0 %331 }
 0x123   : > { %v342_v33 = vpop.permute.xlu1 %341 }
 0x126   : > { %v490_v6 = vpop.permute.xlu0 %489 }
 0x174   : > { %v430_v14 = vpop.f32.mrb[0].mxu0 }
 0x175   : > { %v431_v15 = vadd.f32 %v430_v14, %v327_v13  ;;  %v432_v16 = vpop.f32.mrb[1].mxu0 }
 0x176   : > { %v433_v17 = vadd.f32 %v432_v16, %v327_v13 }
 0x177   : > { %v453_v18 = vmul.f32 0.70710677, %v431_v15 }
 0x178   : > { %v454_v20 = vmul.f32 0.70710677, %v433_v17  ;;  %v436_v21 = vpop.f32.mrb[2].mxu0 }
 0x179   : > { %861 = verf.f32 %v453_v18  ;;  %v437_v22 = vadd.f32 %v436_v21, %v332_v19  ;;  %v438_v23 = vpop.f32.mrb[3].mxu0 }
 0x17a   : > { %863 = verf.f32 %v454_v20  ;;  %v439_v25 = vadd.f32 %v438_v23, %v332_v19 }
 0x17b   : > { %v455_v26 = vmul.f32 0.70710677, %v437_v22 }
 0x17c   : > { %v456_v27 = vmul.f32 0.70710677, %v439_v25  ;;  %v442_v28 = vpop.f32.mrb[4].mxu0 }
 0x17d   : > { %865 = verf.f32 %v455_v26  ;;  %v443_v29 = vadd.f32 %v442_v28, %v337_v24  ;;  %v444_v30 = vpop.f32.mrb[5].mxu0 }
 0x17e   : > { %867 = verf.f32 %v456_v27  ;;  %v445_v31 = vadd.f32 %v444_v30, %v337_v24 }
 0x17f   : > { %v457_v32 = vmul.f32 0.70710677, %v443_v29 }
 0x180   : > { %v458_v34 = vmul.f32 0.70710677, %v445_v31  ;;  %v448_v35 = vpop.f32.mrb[6].mxu0 }
 0x181   : > { %869 = verf.f32 %v457_v32  ;;  %v449_v36 = vadd.f32 %v448_v35, %v342_v33  ;;  %v450_v37 = vpop.f32.mrb[7].mxu0 }
 0x182   : > { %871 = verf.f32 %v458_v34  ;;  %v451_v38 = vadd.f32 %v450_v37, %v342_v33 }
 0x183   : > { %v862_v39 = vpop.eup %861  ;;  %v459_v40 = vmul.f32 0.70710677, %v449_v36 }
 0x184   : > { %v864_v41 = vpop.eup %863  ;;  %v460_v42 = vmul.f32 0.70710677, %v451_v38  ;;  %v469_v43 = vadd.f32 1.0, %v862_v39 }
 0x185   : > { %873 = verf.f32 %v459_v40  ;;  %v470_v45 = vadd.f32 1.0, %v864_v41 }
 0x186   : > { %875 = verf.f32 %v460_v42  ;;  %v477_v49 = vmul.f32 %v469_v43, %v431_v15 }
 0x187   : > { %v866_v44 = vpop.eup %865  ;;  %v478_v52 = vmul.f32 %v470_v45, %v433_v17 }
 0x188   : > { %v868_v46 = vpop.eup %867  ;;  %v471_v47 = vadd.f32 1.0, %v866_v44 }
 0x189   : > { %v472_v48 = vadd.f32 1.0, %v868_v46 }
 0x18a   : > { %v479_v50 = vmul.f32 %v471_v47, %v437_v22 }
 0x18b   : > { %v870_v51 = vpop.eup %869  ;;  %v480_v53 = vmul.f32 %v472_v48, %v439_v25 }
 0x18c   : > { %v872_v54 = vpop.eup %871  ;;  %v745_v55 = vpack.c.bf16 %v479_v50, %v477_v49  ;;  %v473_v57 = vadd.f32 1.0, %v870_v51 }
 0x18d   : > { %v743_v56 = vpack.c.bf16 %v480_v53, %v478_v52  ;;  %v474_v59 = vadd.f32 1.0, %v872_v54 }
 0x18e   : > { %v481_v63 = vmul.f32 %v473_v57, %v443_v29 }
 0x18f   : > { %v874_v58 = vpop.eup %873  ;;  %744 = vmatprep.subr.bf16.mxu1 %v743_v56  ;;  %v482_v1 = vmul.f32 %v474_v59, %v445_v31 }
 0x190   : > { %v876_v60 = vpop.eup %875  ;;  %v475_v61 = vadd.f32 1.0, %v874_v58  ;;  %746 = vmatpush1.bf16.msra.mxu1 %v745_v55 }
 0x191   : > { %v476_v62 = vadd.f32 1.0, %v876_v60 }
 0x192   : > { %v483_v0 = vmul.f32 %v475_v61, %v449_v36 }
 0x193   : > { %v484_v2 = vmul.f32 %v476_v62, %v451_v38 }
 0x194   : > { %v749_v3 = vpack.c.bf16 %v483_v0, %v481_v63 }
 0x195   : > { %v747_v4 = vpack.c.bf16 %v484_v2, %v482_v1 }
 0x197   : > { %748 = vmatprep.subr.bf16.mxu1 %v747_v4 }
 0x198   : > { %750 = vmatpush1.bf16.msra.mxu1 %v749_v3 }
 0x19b   : > { %735 = vmatmul.mubr.msk.f32.vlgmr.msra.gmra.mrb[0].mxu1 %vm492_vm2, %v485_v5 }
 0x26e   : > { %v562_v7 = vpop.f32.mrb[0].mxu1 }
 0x26f   : > { %v563_v8 = vadd.f32 %v562_v7, %v490_v6  ;;  %v564_v9 = vpop.f32.mrb[1].mxu1 }
 0x270   : > { %v565_v10 = vadd.f32 %v564_v9, %v490_v6 }
 0x272   : > { %v569_v11 = vcombine.low %v563_v8, %v565_v10 }
 0x274   : > { %571 = vst [vmem:[%s312_s26] sm:$0xff] %v569_v11 }
 0x275   : > { %1032 = shalt.err (!%p1029_p8)
}
 0x276   : > { %s1033_s16 = scalar_lea.hbm %s1411_s14, 128  ;;  %s1037_s17 = scalar_lea.hbm %s1465_s5, 256 }
 0x277   : > { %p1034_p3 = scmp.ne.s32.totalorder %s1411_s14, %s1033_s16  ;;  %p1038_p13 = scmp.lt.u32.totalorder %s1411_s14, %s1465_s5 }
 0x278   : > { %p1039_p12 = scmp.lt.u32.totalorder %s1037_s17, %s1033_s16  ;;  %p1041_p2 = scmp.lt.u32.totalorder %s1033_s16, %s1411_s14 }
 0x279   : > { %p1035_p11 = pnand %p1034_p3, %p1482_p9 }
 0x27a   : > { %p1040_p4 = por %p1039_p12, %p1038_p13 }
 0x27b   : > { %p1036_p6 = pneg %p1035_p11 }
 0x27c   : > { %p1042_p10 = por %p1041_p2, %p1040_p4 }
 0x27e   : > { %p1043_p1 = pnand %p1042_p10, %p1036_p6 }
 0x280   : > { %1046 = shalt.err (!%p1043_p1)
}
 0x281   : > { %769 = dma.vmem_to_hbm [thread:$0]  (%p1482_p9), %s1413_s10, 128, %s1411_s14, %s573_s29  }
 0x282 PF: > { %s601_s26 = sand.u32 1, %s1089_s18   ;;  %p1483_p0 = scmp.ne.s32.totalorder %s1478_s13, 0 }
 0x283   : > { %p1484_p7 = scmp.ge.s32.totalorder %s1109_s23, 2  ;;  %s602_s8 = scalar_lea.sflag [#allocation4], %s601_s26 }
 0x285   : > { %p789_p5 = pnand %p1484_p7, %p1483_p0 }
 0x287   : > { %1084 = dma.done.wait (!%p789_p5), %s602_s8, 128  }
 0x288   : > { %1086 = vsyncadd (!%p789_p5), %s602_s8, 4294967168  ;;  %s23_s23 = sadd.s32 1, %s1109_s23   ;;  %s1485_s18 = smov %s1093_s19 }
 0x289   : > { %p20_p8 = scmp.ge.s32.totalorder %s23_s23, 4   ;;  %s1486_s19 = smov %s1097_s20 }
 0x28a   : > { %s1487_s20 = smov %s1333_s12  ;;  %s1488_s21 = smov %s1105_s22 }
 0x28b   : > { %s1489_s22 = smov %s1491_s6  ;;  %22 = sbr.rel (!%p20_p8) target bundleno = 8 (0x8), region = 101 }
 0x292   :  { %607 = vsyncpa [#allocation3], 1 }
 0x293   :  { %609 = vsyncpa [#allocation3 + $0x1], 1 }
 0x294   :  { %610 = vsyncpa [#allocation6], 1 }
 0x295   :  { %611 = vsyncpa [#allocation9], 1 }
 0x296   :  { %612 = vsyncpa [#allocation4], 1 }
 0x297   :  { %614 = vsyncpa [#allocation4 + $0x1], 1 }

</bundles_post_ra>
